<compile_context>
chip_gen: v6e
topology: v6e:2x2x1
jax: 0.10.0
libtpu: 0.0.40
codegen_flags: <defaults>
</compile_context>

<pallas_src>
import functools

import jax
import jax.numpy as jnp
from jax.experimental import pallas as pl
from jax.experimental.pallas import tpu as pltpu


def _round_up(x, m):
    return (x + m - 1) // m * m


# ---------------------------------------------------------------------------
# Fused Bottleneck kernel (one grid step == one batch element)
# ---------------------------------------------------------------------------
def _fused_bottleneck_kernel(x_ref, w1_ref, b1_ref, w2_ref, b2_ref,
                             w3_ref, b3_ref, o_ref, *, H, W):
    # x_ref:  (H*W, Cp)  bf16        w1_ref: (Cp, c0)  bf16   b1: (1, c0) f32
    # w2_ref: (9, c0, c1) bf16       b2:     (1, c1)  f32
    # w3_ref: (c1, Cp)   bf16        b3:     (1, Cp)  f32
    # o_ref:  (H*W, Cp)  bf16
    HW = H * W

    # ---- Stage 1: 1x1 conv (BN scale folded into w1) + bias + ReLU ---------
    h1 = jnp.dot(x_ref[...], w1_ref[...], preferred_element_type=jnp.float32)
    h1 = jnp.maximum(h1 + b1_ref[...], 0.0)                       # (HW, c0) f32

    # ---- Stage 2: 3x3 conv (pad=1, stride=1), BN folded, + bias + ReLU -----
    # Nine shifted-tap matmuls: each tap is a roll of the flattened activation
    # along the sublane axis (XLU) plus a static edge mask (VPU select),
    # accumulated in an f32 value. No scratch buffers, no zeroing passes, no
    # lane-misaligned stores.
    p = jax.lax.broadcasted_iota(jnp.int32, (HW, 1), 0)           # flat index
    wcol = p % W
    mask_h = (p >= W, None, p < (H - 1) * W)                      # kh = 0,1,2
    mask_w = (wcol >= 1, None, wcol <= W - 2)                     # kw = 0,1,2

    acc = None
    for kh in range(3):
        for kw in range(3):
            t = kh * 3 + kw
            delta = (kh - 1) * W + (kw - 1)
            if delta == 0:
                tap = h1
            else:
                tap = pltpu.roll(h1, shift=(-delta) % HW, axis=0)
            mask = mask_h[kh]
            if mask_w[kw] is not None:
                mask = mask_w[kw] if mask is None else jnp.logical_and(
                    mask, mask_w[kw])
            if mask is not None:
                tap = jnp.where(mask, tap, 0.0)
            part = jnp.dot(tap.astype(jnp.bfloat16), w2_ref[t],
                           preferred_element_type=jnp.float32)
            acc = part if acc is None else acc + part
    h2 = jnp.maximum(acc + b2_ref[...], 0.0)                      # (HW, c1) f32

    # ---- Stage 3: 1x1 conv + bias + residual add + ReLU --------------------
    y = jnp.dot(h2.astype(jnp.bfloat16), w3_ref[...],
                preferred_element_type=jnp.float32)
    # Re-read the residual from the VMEM-resident input block instead of
    # keeping it live across both big matmuls (lower spill pressure).
    y = y + b3_ref[...] + x_ref[...].astype(jnp.float32)
    o_ref[...] = jnp.maximum(y, 0.0).astype(o_ref.dtype)


# ---------------------------------------------------------------------------
# Bottleneck forward (NCHW in / NCHW out, like the PyTorch module)
# ---------------------------------------------------------------------------
def bottleneck_forward(x_nchw, params, stride=1, expand=False, outplanes=None):
    w1, s1, b1 = params["w1"], params["s1"], params["b1"]   # (Cin,c0),(1,c0),(1,c0)
    w2, s2, b2 = params["w2"], params["s2"], params["b2"]   # (3,3,c0,c1),(1,c1),(1,c1)
    w3, s3, b3 = params["w3"], params["s3"], params["b3"]   # (c1,c2),(1,c2),(1,c2)
    c0, c1, c2 = w1.shape[1], w2.shape[3], w3.shape[1]

    N, Cin, H, W = x_nchw.shape

    # Guards for the downsample=None / identity-ChannelExpand configuration.
    assert stride == 1, "downsample=None path requires stride == 1"
    assert c2 == Cin, "downsample=None path requires cfg[2] == inplanes"
    if expand:
        assert outplanes is None or outplanes == c2, \
            "ChannelExpand only supported as identity (outplanes == cfg[2])"

    # Fold the BatchNorm scale into the conv weights on the host (one-time).
    w1f = w1 * s1                                       # scale per out channel
    w2f = (w2 * s2.reshape(1, 1, 1, c1)).reshape(9, c0, c1)
    w3f = w3 * s3

    # Pad the I/O channel dim up to a multiple of 128 so input loads / output
    # stores are full-lane dense (no-op for real ResNet widths >= 256).
    Cp = _round_up(Cin, 128)
    if Cp != Cin:
        w1f = jnp.concatenate([w1f, jnp.zeros((Cp - Cin, c0), w1f.dtype)], axis=0)
        w3f = jnp.concatenate([w3f, jnp.zeros((c1, Cp - c2), w3f.dtype)], axis=1)
        b3 = jnp.concatenate([b3, jnp.zeros((1, Cp - c2), b3.dtype)], axis=1)

    x = jnp.transpose(x_nchw, (0, 2, 3, 1))             # NHWC
    x2 = x.reshape(N, H * W, Cin)
    if Cp != Cin:
        x2 = jnp.concatenate(
            [x2, jnp.zeros((N, H * W, Cp - Cin), x2.dtype)], axis=-1)
    x2 = x2.astype(jnp.bfloat16)

    kernel = functools.partial(_fused_bottleneck_kernel, H=H, W=W)
    out2 = pl.pallas_call(
        kernel,
        out_shape=jax.ShapeDtypeStruct((N, H * W, Cp), jnp.bfloat16),
        grid_spec=pltpu.PrefetchScalarGridSpec(
            num_scalar_prefetch=0,
            grid=(N,),
            in_specs=[
                pl.BlockSpec((pl.Squeezed(), H * W, Cp), lambda n: (n, 0, 0)),
                pl.BlockSpec((Cp, c0), lambda n: (0, 0)),
                pl.BlockSpec((1, c0), lambda n: (0, 0)),
                pl.BlockSpec((9, c0, c1), lambda n: (0, 0, 0)),
                pl.BlockSpec((1, c1), lambda n: (0, 0)),
                pl.BlockSpec((c1, Cp), lambda n: (0, 0)),
                pl.BlockSpec((1, Cp), lambda n: (0, 0)),
            ],
            out_specs=pl.BlockSpec((pl.Squeezed(), H * W, Cp),
                                   lambda n: (n, 0, 0)),
        ),
        compiler_params=pltpu.CompilerParams(
            dimension_semantics=("parallel",),
            vmem_limit_bytes=64 * 1024 * 1024),
    )(x2,
      w1f.astype(jnp.bfloat16), b1.astype(jnp.float32),
      w2f.astype(jnp.bfloat16), b2.astype(jnp.float32),
      w3f.astype(jnp.bfloat16), b3.astype(jnp.float32))

    out = out2[:, :, :c2].astype(jnp.float32).reshape(N, H, W, c2)
    return jnp.transpose(out, (0, 3, 1, 2))              # back to NCHW


# ---------------------------------------------------------------------------
# Pure-JAX reference (mirrors the PyTorch forward, eval-mode BN, f32)
# ---------------------------------------------------------------------------
def reference_forward(x, rp, stride):
    eps = 1e-5

    def bn(y, g, b, m, v):
        return (y - m[None, :, None, None]) / jnp.sqrt(v[None, :, None, None] + eps) \
               * g[None, :, None, None] + b[None, :, None, None]

    def conv(inp, w, s, pad):
        return jax.lax.conv_general_dilated(
            inp, w, window_strides=(s, s), padding=pad,
            dimension_numbers=("NCHW", "OIHW", "NCHW"))

    out = conv(x, rp["w1_oihw"], 1, "VALID")
    out = jnp.maximum(bn(out, *rp["bn1"]), 0.0)
    out = conv(out, rp["w2_oihw"], stride, ((1, 1), (1, 1)))
    out = jnp.maximum(bn(out, *rp["bn2"]), 0.0)
    out = conv(out, rp["w3_oihw"], 1, "VALID")
    out = bn(out, *rp["bn3"])
    out = out + x                      # downsample None, ChannelExpand identity
    return jnp.maximum(out, 0.0)


def _fold_bn(g, b, m, v, eps=1e-5):
    scale = g / jnp.sqrt(v + eps)
    bias = b - m * scale
    return scale.reshape(1, -1), bias.reshape(1, -1)


if __name__ == "__main__":
    key = jax.random.PRNGKey(0)
    N, inplanes, H, W = 2, 16, 8, 8
    cfg = (8, 8, 16)          # cfg[2] == inplanes so the residual add is valid
    stride = 1

    ks = jax.random.split(key, 8)
    x = jax.random.normal(ks[0], (N, inplanes, H, W), jnp.float32)

    # Conv weights in PyTorch OIHW layout, deterministic.
    w1_oihw = 0.1 * jax.random.normal(ks[1], (cfg[0], inplanes, 1, 1), jnp.float32)
    w2_oihw = 0.1 * jax.random.normal(ks[2], (cfg[1], cfg[0], 3, 3), jnp.float32)
    w3_oihw = 0.1 * jax.random.normal(ks[3], (cfg[2], cfg[1], 1, 1), jnp.float32)

    def bn_params(k, c):
        k1, k2, k3, k4 = jax.random.split(k, 4)
        g = 1.0 + 0.1 * jax.random.normal(k1, (c,), jnp.float32)
        b = 0.1 * jax.random.normal(k2, (c,), jnp.float32)
        m = 0.1 * jax.random.normal(k3, (c,), jnp.float32)
        v = jnp.abs(jax.random.normal(k4, (c,), jnp.float32)) + 0.5
        return g, b, m, v

    bn1 = bn_params(ks[4], cfg[0])
    bn2 = bn_params(ks[5], cfg[1])
    bn3 = bn_params(ks[6], cfg[2])

    # Pallas-layout params: 1x1 conv weights -> (Cin, Cout); 3x3 -> (kh, kw, Cin, Cout).
    s1, b1 = _fold_bn(*bn1)
    s2, b2 = _fold_bn(*bn2)
    s3, b3 = _fold_bn(*bn3)
    pallas_params = dict(
        w1=w1_oihw[:, :, 0, 0].T, s1=s1, b1=b1,
        w2=jnp.transpose(w2_oihw, (2, 3, 1, 0)), s2=s2, b2=b2,
        w3=w3_oihw[:, :, 0, 0].T, s3=s3, b3=b3,
    )
    ref_params = dict(w1_oihw=w1_oihw, w2_oihw=w2_oihw, w3_oihw=w3_oihw,
                      bn1=bn1, bn2=bn2, bn3=bn3)

    out = bottleneck_forward(x, pallas_params, stride=stride, expand=True,
                             outplanes=cfg[2])
    out = jax.block_until_ready(out)

    ref = reference_forward(x, ref_params, stride)
    assert out.shape == (N, cfg[2], H, W), out.shape
    # bf16 matmuls / activations -> relaxed tolerance vs the f32 reference.
    assert jnp.allclose(out, ref, atol=5e-2, rtol=5e-2), \
        float(jnp.max(jnp.abs(out - ref)))
    print("KERNEL_OK")
</pallas_src>

<mosaic_0001>
module attributes {stable_mosaic.version = 11 : i64} {
  func.func @_fused_bottleneck_kernel(%arg0: i32, %arg1: memref<1x64x128xbf16, #tpu.memory_space<vmem>>, %arg2: memref<128x8xbf16, #tpu.memory_space<vmem>>, %arg3: memref<1x8xf32, #tpu.memory_space<vmem>>, %arg4: memref<9x8x8xbf16, #tpu.memory_space<vmem>>, %arg5: memref<1x8xf32, #tpu.memory_space<vmem>>, %arg6: memref<8x128xbf16, #tpu.memory_space<vmem>>, %arg7: memref<1x128xf32, #tpu.memory_space<vmem>>, %arg8: memref<1x64x128xbf16, #tpu.memory_space<vmem>>) attributes {dimension_semantics = [#tpu.dimension_semantics<parallel>], iteration_bounds = array<i64: 2>, scalar_prefetch = 0 : i64, scratch_operands = 0 : i64, tpu.core_type = #tpu.core_type<tc>, window_params = [{transform_indices = @transform_0, window_bounds = array<i64: 1, 64, 128>}, {pipeline_mode = #tpu.pipeline_mode<synchronous>, transform_indices = @transform_1, window_bounds = array<i64: 128, 8>}, {pipeline_mode = #tpu.pipeline_mode<synchronous>, transform_indices = @transform_2, window_bounds = array<i64: 1, 8>}, {pipeline_mode = #tpu.pipeline_mode<synchronous>, transform_indices = @transform_3, window_bounds = array<i64: 9, 8, 8>}, {pipeline_mode = #tpu.pipeline_mode<synchronous>, transform_indices = @transform_4, window_bounds = array<i64: 1, 8>}, {pipeline_mode = #tpu.pipeline_mode<synchronous>, transform_indices = @transform_5, window_bounds = array<i64: 8, 128>}, {pipeline_mode = #tpu.pipeline_mode<synchronous>, transform_indices = @transform_6, window_bounds = array<i64: 1, 128>}, {transform_indices = @transform_7, window_bounds = array<i64: 1, 64, 128>}]} {
    %c0 = arith.constant 0 : index
    %c0_0 = arith.constant 0 : index
    %c0_1 = arith.constant 0 : index
    %0 = vector.load %arg1[%c0, %c0_0, %c0_1] : memref<1x64x128xbf16, #tpu.memory_space<vmem>>, vector<1x64x128xbf16>
    %1 = vector.shape_cast %0 : vector<1x64x128xbf16> to vector<64x128xbf16>
    %c0_2 = arith.constant 0 : index
    %c0_3 = arith.constant 0 : index
    %2 = vector.load %arg2[%c0_2, %c0_3] : memref<128x8xbf16, #tpu.memory_space<vmem>>, vector<128x8xbf16>
    %cst = arith.constant dense<0.000000e+00> : vector<64x8xf32>
    %3 = tpu.matmul %1, %2, %cst {dimension_numbers = #tpu.dot_dimension_numbers<[1], [0], [0], [1], [0, 0, 1, 1], [], []>} : vector<64x128xbf16>, vector<128x8xbf16>, vector<64x8xf32> -> vector<64x8xf32>
    %c0_4 = arith.constant 0 : index
    %c0_5 = arith.constant 0 : index
    %4 = vector.load %arg3[%c0_4, %c0_5] : memref<1x8xf32, #tpu.memory_space<vmem>>, vector<1x8xf32>
    %5 = vector.broadcast %4 : vector<1x8xf32> to vector<64x8xf32>
    %6 = arith.addf %3, %5 : vector<64x8xf32>
    %cst_6 = arith.constant 0.000000e+00 : f32
    %7 = vector.broadcast %cst_6 : f32 to vector<64x8xf32>
    %8 = arith.maximumf %6, %7 : vector<64x8xf32>
    %9 = tpu.iota {dimensions = array<i32: 0>} : vector<64x1xi32>
    %c8_i32 = arith.constant 8 : i32
    %c0_i32 = arith.constant 0 : i32
    %10 = arith.cmpi eq, %c8_i32, %c0_i32 : i32
    %c1_i32 = arith.constant 1 : i32
    %11 = arith.select %10, %c1_i32, %c8_i32 : i32
    %12 = vector.broadcast %11 : i32 to vector<64x1xi32>
    %13 = arith.remsi %9, %12 : vector<64x1xi32>
    %c0_i32_7 = arith.constant 0 : i32
    %14 = vector.broadcast %c0_i32_7 : i32 to vector<64x1xi32>
    %15 = arith.cmpi ne, %13, %14 : vector<64x1xi32>
    %c0_i32_8 = arith.constant 0 : i32
    %16 = vector.broadcast %c0_i32_8 : i32 to vector<64x1xi32>
    %17 = arith.cmpi slt, %13, %16 : vector<64x1xi32>
    %c0_i32_9 = arith.constant 0 : i32
    %18 = arith.cmpi slt, %11, %c0_i32_9 : i32
    %19 = vector.broadcast %18 : i1 to vector<64x1xi1>
    %20 = vector.broadcast %19 : vector<64x1xi1> to vector<64x1xi1>
    %21 = arith.xori %17, %20 : vector<64x1xi1>
    %22 = arith.andi %21, %15 : vector<64x1xi1>
    %23 = vector.broadcast %11 : i32 to vector<64x1xi32>
    %24 = arith.addi %13, %23 : vector<64x1xi32>
    %25 = arith.select %22, %24, %13 : vector<64x1xi1>, vector<64x1xi32>
    %c8_i32_10 = arith.constant 8 : i32
    %26 = vector.broadcast %c8_i32_10 : i32 to vector<64x1xi32>
    %27 = arith.cmpi sge, %9, %26 : vector<64x1xi32>
    %c56_i32 = arith.constant 56 : i32
    %28 = vector.broadcast %c56_i32 : i32 to vector<64x1xi32>
    %29 = arith.cmpi slt, %9, %28 : vector<64x1xi32>
    %c1_i32_11 = arith.constant 1 : i32
    %30 = vector.broadcast %c1_i32_11 : i32 to vector<64x1xi32>
    %31 = arith.cmpi sge, %25, %30 : vector<64x1xi32>
    %c6_i32 = arith.constant 6 : i32
    %32 = vector.broadcast %c6_i32 : i32 to vector<64x1xi32>
    %33 = arith.cmpi sle, %25, %32 : vector<64x1xi32>
    %c9_i32 = arith.constant 9 : i32
    %34 = tpu.dynamic_rotate %8 by %c9_i32 dim 0 : vector<64x8xf32>, i32 -> vector<64x8xf32>
    %35 = arith.andi %27, %31 : vector<64x1xi1>
    %cst_12 = arith.constant 0.000000e+00 : f32
    %36 = vector.shape_cast %35 : vector<64x1xi1> to vector<64x1xi1>
    %37 = vector.broadcast %36 : vector<64x1xi1> to vector<64x8xi1>
    %38 = vector.broadcast %cst_12 : f32 to vector<64x8xf32>
    %39 = arith.select %37, %34, %38 : vector<64x8xi1>, vector<64x8xf32>
    %40 = arith.truncf %39 : vector<64x8xf32> to vector<64x8xbf16>
    %c0_13 = arith.constant 0 : index
    %c0_14 = arith.constant 0 : index
    %c0_15 = arith.constant 0 : index
    %41 = vector.load %arg4[%c0_13, %c0_14, %c0_15] : memref<9x8x8xbf16, #tpu.memory_space<vmem>>, vector<1x8x8xbf16>
    %42 = vector.shape_cast %41 : vector<1x8x8xbf16> to vector<8x8xbf16>
    %cst_16 = arith.constant dense<0.000000e+00> : vector<64x8xf32>
    %43 = tpu.matmul %40, %42, %cst_16 {dimension_numbers = #tpu.dot_dimension_numbers<[1], [0], [0], [1], [0, 0, 1, 1], [], []>} : vector<64x8xbf16>, vector<8x8xbf16>, vector<64x8xf32> -> vector<64x8xf32>
    %c8_i32_17 = arith.constant 8 : i32
    %44 = tpu.dynamic_rotate %8 by %c8_i32_17 dim 0 : vector<64x8xf32>, i32 -> vector<64x8xf32>
    %cst_18 = arith.constant 0.000000e+00 : f32
    %45 = vector.shape_cast %27 : vector<64x1xi1> to vector<64x1xi1>
    %46 = vector.broadcast %45 : vector<64x1xi1> to vector<64x8xi1>
    %47 = vector.broadcast %cst_18 : f32 to vector<64x8xf32>
    %48 = arith.select %46, %44, %47 : vector<64x8xi1>, vector<64x8xf32>
    %49 = arith.truncf %48 : vector<64x8xf32> to vector<64x8xbf16>
    %c1 = arith.constant 1 : index
    %c0_19 = arith.constant 0 : index
    %c0_20 = arith.constant 0 : index
    %50 = vector.load %arg4[%c1, %c0_19, %c0_20] : memref<9x8x8xbf16, #tpu.memory_space<vmem>>, vector<1x8x8xbf16>
    %51 = vector.shape_cast %50 : vector<1x8x8xbf16> to vector<8x8xbf16>
    %cst_21 = arith.constant dense<0.000000e+00> : vector<64x8xf32>
    %52 = tpu.matmul %49, %51, %cst_21 {dimension_numbers = #tpu.dot_dimension_numbers<[1], [0], [0], [1], [0, 0, 1, 1], [], []>} : vector<64x8xbf16>, vector<8x8xbf16>, vector<64x8xf32> -> vector<64x8xf32>
    %53 = arith.addf %43, %52 : vector<64x8xf32>
    %c7_i32 = arith.constant 7 : i32
    %54 = tpu.dynamic_rotate %8 by %c7_i32 dim 0 : vector<64x8xf32>, i32 -> vector<64x8xf32>
    %55 = arith.andi %27, %33 : vector<64x1xi1>
    %cst_22 = arith.constant 0.000000e+00 : f32
    %56 = vector.shape_cast %55 : vector<64x1xi1> to vector<64x1xi1>
    %57 = vector.broadcast %56 : vector<64x1xi1> to vector<64x8xi1>
    %58 = vector.broadcast %cst_22 : f32 to vector<64x8xf32>
    %59 = arith.select %57, %54, %58 : vector<64x8xi1>, vector<64x8xf32>
    %60 = arith.truncf %59 : vector<64x8xf32> to vector<64x8xbf16>
    %c2 = arith.constant 2 : index
    %c0_23 = arith.constant 0 : index
    %c0_24 = arith.constant 0 : index
    %61 = vector.load %arg4[%c2, %c0_23, %c0_24] : memref<9x8x8xbf16, #tpu.memory_space<vmem>>, vector<1x8x8xbf16>
    %62 = vector.shape_cast %61 : vector<1x8x8xbf16> to vector<8x8xbf16>
    %cst_25 = arith.constant dense<0.000000e+00> : vector<64x8xf32>
    %63 = tpu.matmul %60, %62, %cst_25 {dimension_numbers = #tpu.dot_dimension_numbers<[1], [0], [0], [1], [0, 0, 1, 1], [], []>} : vector<64x8xbf16>, vector<8x8xbf16>, vector<64x8xf32> -> vector<64x8xf32>
    %64 = arith.addf %53, %63 : vector<64x8xf32>
    %c1_i32_26 = arith.constant 1 : i32
    %65 = tpu.dynamic_rotate %8 by %c1_i32_26 dim 0 : vector<64x8xf32>, i32 -> vector<64x8xf32>
    %cst_27 = arith.constant 0.000000e+00 : f32
    %66 = vector.shape_cast %31 : vector<64x1xi1> to vector<64x1xi1>
    %67 = vector.broadcast %66 : vector<64x1xi1> to vector<64x8xi1>
    %68 = vector.broadcast %cst_27 : f32 to vector<64x8xf32>
    %69 = arith.select %67, %65, %68 : vector<64x8xi1>, vector<64x8xf32>
    %70 = arith.truncf %69 : vector<64x8xf32> to vector<64x8xbf16>
    %c3 = arith.constant 3 : index
    %c0_28 = arith.constant 0 : index
    %c0_29 = arith.constant 0 : index
    %71 = vector.load %arg4[%c3, %c0_28, %c0_29] : memref<9x8x8xbf16, #tpu.memory_space<vmem>>, vector<1x8x8xbf16>
    %72 = vector.shape_cast %71 : vector<1x8x8xbf16> to vector<8x8xbf16>
    %cst_30 = arith.constant dense<0.000000e+00> : vector<64x8xf32>
    %73 = tpu.matmul %70, %72, %cst_30 {dimension_numbers = #tpu.dot_dimension_numbers<[1], [0], [0], [1], [0, 0, 1, 1], [], []>} : vector<64x8xbf16>, vector<8x8xbf16>, vector<64x8xf32> -> vector<64x8xf32>
    %74 = arith.addf %64, %73 : vector<64x8xf32>
    %75 = arith.truncf %8 : vector<64x8xf32> to vector<64x8xbf16>
    %c4 = arith.constant 4 : index
    %c0_31 = arith.constant 0 : index
    %c0_32 = arith.constant 0 : index
    %76 = vector.load %arg4[%c4, %c0_31, %c0_32] : memref<9x8x8xbf16, #tpu.memory_space<vmem>>, vector<1x8x8xbf16>
    %77 = vector.shape_cast %76 : vector<1x8x8xbf16> to vector<8x8xbf16>
    %cst_33 = arith.constant dense<0.000000e+00> : vector<64x8xf32>
    %78 = tpu.matmul %75, %77, %cst_33 {dimension_numbers = #tpu.dot_dimension_numbers<[1], [0], [0], [1], [0, 0, 1, 1], [], []>} : vector<64x8xbf16>, vector<8x8xbf16>, vector<64x8xf32> -> vector<64x8xf32>
    %79 = arith.addf %74, %78 : vector<64x8xf32>
    %c63_i32 = arith.constant 63 : i32
    %80 = tpu.dynamic_rotate %8 by %c63_i32 dim 0 : vector<64x8xf32>, i32 -> vector<64x8xf32>
    %cst_34 = arith.constant 0.000000e+00 : f32
    %81 = vector.shape_cast %33 : vector<64x1xi1> to vector<64x1xi1>
    %82 = vector.broadcast %81 : vector<64x1xi1> to vector<64x8xi1>
    %83 = vector.broadcast %cst_34 : f32 to vector<64x8xf32>
    %84 = arith.select %82, %80, %83 : vector<64x8xi1>, vector<64x8xf32>
    %85 = arith.truncf %84 : vector<64x8xf32> to vector<64x8xbf16>
    %c5 = arith.constant 5 : index
    %c0_35 = arith.constant 0 : index
    %c0_36 = arith.constant 0 : index
    %86 = vector.load %arg4[%c5, %c0_35, %c0_36] : memref<9x8x8xbf16, #tpu.memory_space<vmem>>, vector<1x8x8xbf16>
    %87 = vector.shape_cast %86 : vector<1x8x8xbf16> to vector<8x8xbf16>
    %cst_37 = arith.constant dense<0.000000e+00> : vector<64x8xf32>
    %88 = tpu.matmul %85, %87, %cst_37 {dimension_numbers = #tpu.dot_dimension_numbers<[1], [0], [0], [1], [0, 0, 1, 1], [], []>} : vector<64x8xbf16>, vector<8x8xbf16>, vector<64x8xf32> -> vector<64x8xf32>
    %89 = arith.addf %79, %88 : vector<64x8xf32>
    %c57_i32 = arith.constant 57 : i32
    %90 = tpu.dynamic_rotate %8 by %c57_i32 dim 0 : vector<64x8xf32>, i32 -> vector<64x8xf32>
    %91 = arith.andi %29, %31 : vector<64x1xi1>
    %cst_38 = arith.constant 0.000000e+00 : f32
    %92 = vector.shape_cast %91 : vector<64x1xi1> to vector<64x1xi1>
    %93 = vector.broadcast %92 : vector<64x1xi1> to vector<64x8xi1>
    %94 = vector.broadcast %cst_38 : f32 to vector<64x8xf32>
    %95 = arith.select %93, %90, %94 : vector<64x8xi1>, vector<64x8xf32>
    %96 = arith.truncf %95 : vector<64x8xf32> to vector<64x8xbf16>
    %c6 = arith.constant 6 : index
    %c0_39 = arith.constant 0 : index
    %c0_40 = arith.constant 0 : index
    %97 = vector.load %arg4[%c6, %c0_39, %c0_40] : memref<9x8x8xbf16, #tpu.memory_space<vmem>>, vector<1x8x8xbf16>
    %98 = vector.shape_cast %97 : vector<1x8x8xbf16> to vector<8x8xbf16>
    %cst_41 = arith.constant dense<0.000000e+00> : vector<64x8xf32>
    %99 = tpu.matmul %96, %98, %cst_41 {dimension_numbers = #tpu.dot_dimension_numbers<[1], [0], [0], [1], [0, 0, 1, 1], [], []>} : vector<64x8xbf16>, vector<8x8xbf16>, vector<64x8xf32> -> vector<64x8xf32>
    %100 = arith.addf %89, %99 : vector<64x8xf32>
    %c56_i32_42 = arith.constant 56 : i32
    %101 = tpu.dynamic_rotate %8 by %c56_i32_42 dim 0 : vector<64x8xf32>, i32 -> vector<64x8xf32>
    %cst_43 = arith.constant 0.000000e+00 : f32
    %102 = vector.shape_cast %29 : vector<64x1xi1> to vector<64x1xi1>
    %103 = vector.broadcast %102 : vector<64x1xi1> to vector<64x8xi1>
    %104 = vector.broadcast %cst_43 : f32 to vector<64x8xf32>
    %105 = arith.select %103, %101, %104 : vector<64x8xi1>, vector<64x8xf32>
    %106 = arith.truncf %105 : vector<64x8xf32> to vector<64x8xbf16>
    %c7 = arith.constant 7 : index
    %c0_44 = arith.constant 0 : index
    %c0_45 = arith.constant 0 : index
    %107 = vector.load %arg4[%c7, %c0_44, %c0_45] : memref<9x8x8xbf16, #tpu.memory_space<vmem>>, vector<1x8x8xbf16>
    %108 = vector.shape_cast %107 : vector<1x8x8xbf16> to vector<8x8xbf16>
    %cst_46 = arith.constant dense<0.000000e+00> : vector<64x8xf32>
    %109 = tpu.matmul %106, %108, %cst_46 {dimension_numbers = #tpu.dot_dimension_numbers<[1], [0], [0], [1], [0, 0, 1, 1], [], []>} : vector<64x8xbf16>, vector<8x8xbf16>, vector<64x8xf32> -> vector<64x8xf32>
    %110 = arith.addf %100, %109 : vector<64x8xf32>
    %c55_i32 = arith.constant 55 : i32
    %111 = tpu.dynamic_rotate %8 by %c55_i32 dim 0 : vector<64x8xf32>, i32 -> vector<64x8xf32>
    %112 = arith.andi %29, %33 : vector<64x1xi1>
    %cst_47 = arith.constant 0.000000e+00 : f32
    %113 = vector.shape_cast %112 : vector<64x1xi1> to vector<64x1xi1>
    %114 = vector.broadcast %113 : vector<64x1xi1> to vector<64x8xi1>
    %115 = vector.broadcast %cst_47 : f32 to vector<64x8xf32>
    %116 = arith.select %114, %111, %115 : vector<64x8xi1>, vector<64x8xf32>
    %117 = arith.truncf %116 : vector<64x8xf32> to vector<64x8xbf16>
    %c8 = arith.constant 8 : index
    %c0_48 = arith.constant 0 : index
    %c0_49 = arith.constant 0 : index
    %118 = vector.load %arg4[%c8, %c0_48, %c0_49] : memref<9x8x8xbf16, #tpu.memory_space<vmem>>, vector<1x8x8xbf16>
    %119 = vector.shape_cast %118 : vector<1x8x8xbf16> to vector<8x8xbf16>
    %cst_50 = arith.constant dense<0.000000e+00> : vector<64x8xf32>
    %120 = tpu.matmul %117, %119, %cst_50 {dimension_numbers = #tpu.dot_dimension_numbers<[1], [0], [0], [1], [0, 0, 1, 1], [], []>} : vector<64x8xbf16>, vector<8x8xbf16>, vector<64x8xf32> -> vector<64x8xf32>
    %121 = arith.addf %110, %120 : vector<64x8xf32>
    %c0_51 = arith.constant 0 : index
    %c0_52 = arith.constant 0 : index
    %122 = vector.load %arg5[%c0_51, %c0_52] : memref<1x8xf32, #tpu.memory_space<vmem>>, vector<1x8xf32>
    %123 = vector.broadcast %122 : vector<1x8xf32> to vector<64x8xf32>
    %124 = arith.addf %121, %123 : vector<64x8xf32>
    %cst_53 = arith.constant 0.000000e+00 : f32
    %125 = vector.broadcast %cst_53 : f32 to vector<64x8xf32>
    %126 = arith.maximumf %124, %125 : vector<64x8xf32>
    %127 = arith.truncf %126 : vector<64x8xf32> to vector<64x8xbf16>
    %c0_54 = arith.constant 0 : index
    %c0_55 = arith.constant 0 : index
    %128 = vector.load %arg6[%c0_54, %c0_55] : memref<8x128xbf16, #tpu.memory_space<vmem>>, vector<8x128xbf16>
    %cst_56 = arith.constant dense<0.000000e+00> : vector<64x128xf32>
    %129 = tpu.matmul %127, %128, %cst_56 {dimension_numbers = #tpu.dot_dimension_numbers<[1], [0], [0], [1], [0, 0, 1, 1], [], []>} : vector<64x8xbf16>, vector<8x128xbf16>, vector<64x128xf32> -> vector<64x128xf32>
    %c0_57 = arith.constant 0 : index
    %c0_58 = arith.constant 0 : index
    %130 = vector.load %arg7[%c0_57, %c0_58] : memref<1x128xf32, #tpu.memory_space<vmem>>, vector<1x128xf32>
    %131 = vector.broadcast %130 : vector<1x128xf32> to vector<64x128xf32>
    %132 = arith.addf %129, %131 : vector<64x128xf32>
    %c0_59 = arith.constant 0 : index
    %c0_60 = arith.constant 0 : index
    %c0_61 = arith.constant 0 : index
    %133 = vector.load %arg1[%c0_59, %c0_60, %c0_61] : memref<1x64x128xbf16, #tpu.memory_space<vmem>>, vector<1x64x128xbf16>
    %134 = vector.shape_cast %133 : vector<1x64x128xbf16> to vector<64x128xbf16>
    %135 = arith.extf %134 : vector<64x128xbf16> to vector<64x128xf32>
    %136 = arith.addf %132, %135 : vector<64x128xf32>
    %cst_62 = arith.constant 0.000000e+00 : f32
    %137 = vector.broadcast %cst_62 : f32 to vector<64x128xf32>
    %138 = arith.maximumf %136, %137 : vector<64x128xf32>
    %139 = arith.truncf %138 : vector<64x128xf32> to vector<64x128xbf16>
    %c0_63 = arith.constant 0 : index
    %c0_64 = arith.constant 0 : index
    %c0_65 = arith.constant 0 : index
    %140 = vector.load %arg8[%c0_63, %c0_64, %c0_65] : memref<1x64x128xbf16, #tpu.memory_space<vmem>>, vector<1x64x128xbf16>
    %141 = vector.shape_cast %140 : vector<1x64x128xbf16> to vector<64x128xbf16>
    %142 = vector.shape_cast %139 : vector<64x128xbf16> to vector<1x64x128xbf16>
    tpu.vector_store %arg8[%c0_63, %c0_64, %c0_65], %142 {strides = array<i32>} : memref<1x64x128xbf16, #tpu.memory_space<vmem>>, vector<1x64x128xbf16>,
    return
  }
  func.func @transform_0(%arg0: i32) -> (i32, i32, i32) {
    %c0_i32 = arith.constant 0 : i32
    %c0_i32_0 = arith.constant 0 : i32
    %c0_i32_1 = arith.constant 0 : i32
    return %arg0, %c0_i32, %c0_i32_0 : i32, i32, i32
  }
  func.func @transform_1(%arg0: i32) -> (i32, i32) {
    %c0_i32 = arith.constant 0 : i32
    %c0_i32_0 = arith.constant 0 : i32
    %c0_i32_1 = arith.constant 0 : i32
    return %c0_i32, %c0_i32_0 : i32, i32
  }
  func.func @transform_2(%arg0: i32) -> (i32, i32) {
    %c0_i32 = arith.constant 0 : i32
    %c0_i32_0 = arith.constant 0 : i32
    %c0_i32_1 = arith.constant 0 : i32
    return %c0_i32, %c0_i32_0 : i32, i32
  }
  func.func @transform_3(%arg0: i32) -> (i32, i32, i32) {
    %c0_i32 = arith.constant 0 : i32
    %c0_i32_0 = arith.constant 0 : i32
    %c0_i32_1 = arith.constant 0 : i32
    %c0_i32_2 = arith.constant 0 : i32
    return %c0_i32, %c0_i32_0, %c0_i32_1 : i32, i32, i32
  }
  func.func @transform_4(%arg0: i32) -> (i32, i32) {
    %c0_i32 = arith.constant 0 : i32
    %c0_i32_0 = arith.constant 0 : i32
    %c0_i32_1 = arith.constant 0 : i32
    return %c0_i32, %c0_i32_0 : i32, i32
  }
  func.func @transform_5(%arg0: i32) -> (i32, i32) {
    %c0_i32 = arith.constant 0 : i32
    %c0_i32_0 = arith.constant 0 : i32
    %c0_i32_1 = arith.constant 0 : i32
    return %c0_i32, %c0_i32_0 : i32, i32
  }
  func.func @transform_6(%arg0: i32) -> (i32, i32) {
    %c0_i32 = arith.constant 0 : i32
    %c0_i32_0 = arith.constant 0 : i32
    %c0_i32_1 = arith.constant 0 : i32
    return %c0_i32, %c0_i32_0 : i32, i32
  }
  func.func @transform_7(%arg0: i32) -> (i32, i32, i32) {
    %c0_i32 = arith.constant 0 : i32
    %c0_i32_0 = arith.constant 0 : i32
    %c0_i32_1 = arith.constant 0 : i32
    return %arg0, %c0_i32, %c0_i32_0 : i32, i32, i32
  }
}

</mosaic_0001>

<bundles_post_ra>
// kernel: tpu_custom_call.1
= control target key start
LH: loop header
LB: loop body
LE: loop exit
PB: predicated region body
PF: predicated region fallthrough
CT: control target
= control target key end

     0   :  { %12 = vsyncpa [#allocation3], 0  ;;  %s3063_s0 = inlined_call_operand.vmem [shape: bf16[2,64,128], index: 0, kind: input, shape index: {}]   ;;  %s3064_s1 = inlined_call_operand.vmem [shape: bf16[128,8], index: 1, kind: input, shape index: {}]   ;;  %s3065_s2 = inlined_call_operand.vmem [shape: f32[1,8], index: 2, kind: input, shape index: {}]   ;;  %s3066_s3 = inlined_call_operand.vmem [shape: bf16[9,8,8], index: 3, kind: input, shape index: {}]   ;;  %s3067_s4 = inlined_call_operand.vmem [shape: f32[1,8], index: 4, kind: input, shape index: {}]   ;;  %s3068_s5 = inlined_call_operand.vmem [shape: bf16[8,128], index: 5, kind: input, shape index: {}]   ;;  %s3069_s6 = inlined_call_operand.vmem [shape: f32[1,128], index: 6, kind: input, shape index: {}]   ;;  %s3070_s7 = inlined_call_operand.hbm [shape: bf16[2,64,128], index: 7, kind: output, shape index: {}]  }
   0x1   :  { %14 = vsyncpa [#allocation3 + $0x1], 0  ;;  %s2414_s24 = smov 0   ;;  %s2416_s25 = smov 0  }
   0x2   :  { %s2418_s26 = smov 0   ;;  %s2420_s27 = smov 0  }
   0x3 LB: > { %s2435_s28 = sadd.s32 4294967295, %s2368_s27   ;;  %s1935_s29 = sadd.s32 4294967294, %s2368_s27   ;;  %s2368_s27 = sphi %s2420_s27, %s3151_s27   ;;  %s2364_s26 = sphi %s2418_s26, %s3150_s26   ;;  %s2360_s25 = sphi %s2416_s25, %s3149_s25   ;;  %s2356_s24 = sphi %s2414_s24, %s3148_s24  }
   0x4   : > { %s2439_s30 = sadd.s32 1, %s2368_s27   ;;  %s179_s8 = sadd.s32 1, %s2364_s26 }
   0x5   : > { %s176_s9 = ssub.s32 %s2368_s27, %s2439_s30  ;;  %p189_p0 = scmp.ne.s32.totalorder %s2364_s26, %s2360_s25 }
   0x6   : > { %p177_p1 = scmp.eq.s32.totalorder %s176_s9, 0  ;;  %p190_p2 = scmp.eq.s32.totalorder %s2435_s28, 1 }
   0x7   : > { %p195_p3 = scmp.ne.s32.totalorder %s2360_s25, %s2356_s24  ;;  %p196_p4 = scmp.eq.s32.totalorder %s1935_s29, 1 }
   0x8   : > { %s2450_s10 = scalar_select %p177_p1, %s2364_s26, %s179_s8  }
   0x9   : > { %p2452_p5 = por %p190_p2, %p189_p0  ;;  %p2456_p6 = por %p196_p4, %p195_p3 }
   0xa   : > { %p1938_p7 = scmp.ge.s32.totalorder %s2368_s27, 1  ;;  %p240_p8 = scmp.lt.s32.totalorder %s2368_s27, 3 }
   0xc   : > { %p241_p9 = pnand %p1938_p7, %p240_p8 }
   0xe   : > { %244 = sbr.rel (%p241_p9) target bundleno = 782 (0x30e), region = 48 }
  0x13   : > { %v2292_v0 = vld [vmem:[%s3064_s1 + $0x38] sm:$0xff]   ;;  %p272_p10 = scmp.lt.s32.totalorder %s2435_s28, 1  ;;  %v2293_v1 = vld [vmem:[%s3064_s1 + $0x30] sm:$0xff]   ;;  %v2294_v2 = vld [vmem:[%s3064_s1 + $0x28] sm:$0xff]   ;;  %vm3076_vm0 = vcmask 1043456   ;;  %v454_v18 = vlaneseq  ;;  %vm675_vm1 = vcmask 64512  }
  0x14   : > { %2113 = vmatprep.subr.bf16.mxu0 %v2292_v0  ;;  %v2295_v3 = vld [vmem:[%s3064_s1 + $0x20] sm:$0xff]   ;;  %v2296_v5 = vld [vmem:[%s3064_s1 + $0x18] sm:$0xff]   ;;  %v2297_v6 = vld [vmem:[%s3064_s1 + $0x10] sm:$0xff]   ;;  %v2370_v40 = vmov 0.0   ;;  %v3093_v45 = vmov 0  ;;  %v3095_v47 = vmov 0 }
  0x15   : > { %s273_s17 = scalar_select %p272_p10, %s2435_s28, 1  ;;  %2114 = vmatpush3.bf16.msra.mxu0 %v2292_v0  ;;  %v2298_v7 = vld [vmem:[%s3064_s1 + $0x8] sm:$0xff]   ;;  %v2299_v8 = vld [vmem:[%s3064_s1] sm:$0xff]   ;;  %v2527_v17 = vld [vmem:[%s3066_s3 + $0x14] sm:$0xf]  ;;  %v2531_v19 = vshrl.u32 %v454_v18, 7 }
  0x16   : > { %2115 = vmatprep.subr.bf16.mxu0 %v2293_v1  ;;  %v1955_v12 = vld [vmem:[%s3066_s3 + $0x4] sm:$0xf]  ;;  %v644_v14 = vld [vmem:[%s3066_s3] sm:$0xf]  ;;  %v2515_v15 = vld [vmem:[%s3066_s3 + $0xc] sm:$0xf] }
  0x17   : > { %s2018_s20 = sshll.u32 %s273_s17, 5  ;;  %2239 = vmatprep.subr.msk.bf16.mxu1 %vm3076_vm0, %v1955_v12  ;;  %v690_v13 = vsel %vm3076_vm0, %v1955_v12, 0  ;;  %v2521_v16 = vsel %vm3076_vm0, %v2515_v15, 0  ;;  %v1942_v21 = vld [vmem:[%s3065_s2] ss:$0 sm:$0xff]  ;;  %v2537_v23 = vadd.s32 24, %v2531_v19 }
  0x18   : > { %s276_s23 = scalar_lea.vmem %s3063_s0, %s2018_s20  ;;  %2138 = vmatpush3.bf16.msra.mxu1 %v690_v13  ;;  %v457_v24 = vadd.s32 16, %v2531_v19  ;;  %v456_v27 = vadd.s32 8, %v2531_v19  ;;  %v467_v33 = vand.u32 7, %v2531_v19  ;;  %v2548_v37 = vadd.s32 32, %v2531_v19  ;;  %v1964_v63 = vld [vmem:[%s3066_s3 + $0x8] sm:$0xf] }
  0x19   : > { %2116 = vmatpush3.bf16.msra.mxu0 %v2293_v1  ;;  %v2479_v4 = vld [vmem:[%s276_s23] sm:$0xff]   ;;  %v2494_v9 = vld [vmem:[%s276_s23 + $0x8] sm:$0xff]   ;;  %v2496_v10 = vld [vmem:[%s276_s23 + $0x10] sm:$0xff]   ;;  %2240 = vmatprep.subr.msk.bf16.mxu1 %vm3076_vm0, %v644_v14  ;;  %v488_v31 = vand.u32 7, %v2537_v23  ;;  %v2551_v38 = vadd.s32 40, %v2531_v19  ;;  %vm3075_vm2 = vcmp.lt.s32.totalorder %v2531_v19, 1 }
  0x1a   : > { %2117 = vmatprep.subr.bf16.mxu0 %v2294_v2  ;;  %3089 = vst [vmem:[#allocation5_spill] sm:$0xff] %v2479_v4  ;;  %2129 = vmatprep.mubr.bf16.mxu0 %v2479_v4  ;;  %3090 = vst [vmem:[#allocation6_spill] sm:$0xff] %v2494_v9  ;;  %v2500_v11 = vld [vmem:[%s276_s23 + $0x18] sm:$0xff]   ;;  %v481_v34 = vand.u32 7, %v457_v24  ;;  %v474_v42 = vand.u32 7, %v456_v27  ;;  %vm3072_vm4 = vcmp.lt.s32.totalorder %v2531_v19, 7 }
  0x1b   : > { %3091 = vst [vmem:[#allocation7_spill] sm:$0xff] %v2496_v10  ;;  %3092 = vst [vmem:[#allocation8_spill] sm:$0xff] %v2500_v11  ;;  %vm2560_vm3 = vcmp.ge.s32.totalorder %v488_v31, 1  ;;  %v3097_v48 = vmov 0  ;;  %vm2575_vm7 = vcmp.ge.s32.totalorder %v467_v33, 1  ;;  %v3099_v50 = vmov 0 }
  0x1c   : > { %v3094_v45 = vsel %vm2560_vm3, 4294967295, %v3093_v45  ;;  %vm2566_vm5 = vcmp.ge.s32.totalorder %v474_v42, 1  ;;  %vm2570_vm6 = vcmp.ge.s32.totalorder %v481_v34, 1  ;;  %v3100_v50 = vsel %vm2575_vm7, 4294967295, %v3099_v50  ;;  %s269_s18 = sand.u32 1, %s2360_s25   ;;  %s2027_s22 = sshll.u32 %s2435_s28, 9 }
  0x1d   : > { %2118 = vmatpush3.bf16.msra.mxu0 %v2294_v2  ;;  %v3096_v47 = vsel %vm2566_vm5, 4294967295, %v3095_v47  ;;  %v3098_v48 = vsel %vm2570_vm6, 4294967295, %v3097_v48  ;;  %vm2579_vm8 = vcmp.le.s32.totalorder %v467_v33, 6  ;;  %v495_v52 = vand.u32 7, %v2548_v37  ;;  %s1939_s19 = sshll.u32 %s269_s18, 5  ;;  %s3017_s8 = scalar_lea.hbm %s3070_s7, %s2027_s22 }
  0x1e   : > { %2119 = vmatprep.subr.bf16.mxu0 %v2295_v3  ;;  %v502_v53 = vand.u32 7, %v2551_v38  ;;  %v770_v58 = vsel %vm3076_vm0, %v644_v14, 0  ;;  %vm2591_vm9 = vcmp.le.s32.totalorder %v474_v42, 6  ;;  %v2600_v0 = vadd.s32 48, %v2531_v19  ;;  %s271_s20 = scalar_lea.vmem [#allocation2], %s1939_s19  ;;  %s3023_s9 = scalar_lea.sflag [#allocation3], %s269_s18 }
  0x1f   : > { %vm2636_vm11 = vcmp.le.s32.totalorder %v481_v34, 6  ;;  %vm2650_vm12 = vcmp.le.s32.totalorder %v488_v31, 6  ;;  %vm2654_vm13 = vcmp.ge.s32.totalorder %v495_v52, 1  ;;  %vm2711_vm14 = vcmp.le.s32.totalorder %v495_v52, 6  ;;  %s1873_s21 = sshll.u32 %s271_s20, 4  ;;  %s2371_s13 = smov [#allocation2]   ;;  %s3019_s21 = int_to_ptr.vmem [resolvable:$true] %s1873_s21 }
  0x20   : > { %vm2622_vm10 = vcmp.ge.s32.totalorder %v502_v53, 1  ;;  %vm2740_vm15 = vcmp.le.s32.totalorder %v502_v53, 6  ;;  %s2308_s28 = scalar_lea.vmem %s3019_s21, 512  ;;  %s2312_s14 = sshll.u32 %s2371_s13, 4  ;;  %s2313_s14 = int_to_ptr.vmem [resolvable:$false] %s2312_s14 }
  0x21   : > { %2120 = vmatpush3.bf16.msra.mxu0 %v2295_v3  ;;  %p2309_p11 = scmp.ne.s32.totalorder %s3019_s21, %s2308_s28  ;;  %s2314_s15 = scalar_lea.vmem %s2313_s14, 1024 }
  0x22   : > { %2121 = vmatprep.subr.bf16.mxu0 %v2296_v5  ;;  %p2315_p0 = scmp.lt.s32.totalorder %s3019_s21, %s2313_s14  ;;  %p2316_p1 = scmp.lt.s32.totalorder %s2314_s15, %s2308_s28 }
  0x23   : > { %p2310_p12 = pnand %p2309_p11, %p2452_p5 }
  0x24   : > { %p2317_p2 = por %p2316_p1, %p2315_p0 }
  0x25   : > { %2122 = vmatpush3.bf16.msra.mxu0 %v2296_v5  ;;  %p2311_p13 = pneg %p2310_p12 }
  0x26   : > { %2123 = vmatprep.subr.bf16.mxu0 %v2297_v6 }
  0x27   : > { %p2318_p3 = pnand %p2317_p2, %p2311_p13 }
  0x29   : > { %2124 = vmatpush3.bf16.msra.mxu0 %v2297_v6  ;;  %v2609_v6 = vadd.s32 56, %v2531_v19 }
  0x2a   : > { %2125 = vmatprep.subr.bf16.mxu0 %v2298_v7 }
  0x2d   : > { %2126 = vmatpush3.bf16.msra.mxu0 %v2298_v7 }
  0x2e   : > { %2127 = vmatprep.subr.bf16.mxu0 %v2299_v8 }
  0x31   : > { %2128 = vmatpush3.bf16.msra.mxu0 %v2299_v8 }
  0x32   : > { %2242 = vmatprep.subr.msk.bf16.mxu0 %vm3076_vm0, %v2515_v15 }
  0x34   : > { %2130 = vmatmul.mubr.bf16.vlgmr.msra.gmra.mxu0 %v2494_v9 }
  0x35   : > { %2133 = vmatprep.mubr.bf16.mxu0 %v2496_v10  ;;  %2168 = vmatpush3.bf16.msra.mxu0 %v2521_v16 }
  0x36   : > { %2245 = vmatprep.subr.msk.bf16.mxu0 %vm3076_vm0, %v2527_v17 }
  0x3c   : > { %2134 = vmatmul.mubr.bf16.gmra.mxu0 %v2500_v11 }
  0xf4   : > { %v2131_v20 = vpop.f32.mrf.mxu0 }
  0xf5   : > { %v424_v28 = vadd.f32 %v2131_v20, %v1942_v21 }
  0xf6   : > { %v415_v22 = vpop.f32.mrf.mxu0 }
  0xf7   : > { %v416_v25 = vadd.f32 %v1942_v21, %v415_v22  ;;  %v2555_v43 = vmax.f32 %v424_v28, 0.0 }
  0xf8   : > { %v2132_v26 = vpop.f32.mrf.mxu0 }
  0xf9   : > { %v2541_v29 = vmax.f32 %v416_v25, 0.0  ;;  %v427_v30 = vadd.f32 %v2132_v26, %v1942_v21  ;;  %v593_v60 = vrot.slane %v2555_v43, 7  ;;  %v839_v1 = vrot.slane %v2555_v43, 1 }
  0xfa   : > { %v418_v32 = vpop.f32.mrf.mxu0 }
  0xfb   : > { %v2545_v35 = vmax.f32 %v427_v30, 0.0  ;;  %v419_v36 = vadd.f32 %v1942_v21, %v418_v32  ;;  %v669_v41 = vpack.c.bf16 %v2541_v29, %v2370_v40  ;;  %v591_v7 = vrot.slane %v2541_v29, 7 }
  0xfc   : > { %v2135_v39 = vpop.f32.mrf.mxu0  ;;  %v837_v18 = vrot.slane %v2541_v29, 1 }
  0xfd   : > { %v2558_v44 = vmax.f32 %v419_v36, 0.0  ;;  %2139 = vmatprep.mubr.msk.bf16.mxu1 %vm675_vm1, %v669_v41  ;;  %v594_v49 = vrot.slane %v2545_v35, 7  ;;  %v440_v61 = vadd.f32 %v2135_v39, %v1942_v21  ;;  %v840_v20 = vrot.slane %v2545_v35, 1 }
  0xfe   : > { %v431_v46 = vpop.f32.mrf.mxu0 }
  0xff   : > { %v592_v54 = vrot.slane %v2558_v44, 7  ;;  %v432_v55 = vadd.f32 %v1942_v21, %v431_v46  ;;  %v2588_v57 = vpack.c.bf16 %v2555_v43, %v2558_v44  ;;  %v838_v2 = vrot.slane %v2558_v44, 1 }
 0x100   : > { %v2136_v56 = vpop.f32.mrf.mxu0  ;;  %v2616_v8 = vsel %vm3075_vm2, %v593_v60, %v594_v49  ;;  %v2641_v24 = vmax.f32 %v440_v61, 0.0  ;;  %v850_v38 = vsel %vm3072_vm4, %v839_v1, %v840_v20 }
 0x101   : > { %v443_v62 = vadd.f32 %v2136_v56, %v1942_v21  ;;  %v2604_v3 = vmax.f32 %v432_v55, 0.0  ;;  %2140 = vmatmul.mubr.msk.bf16.vlgmr.msra.gmra.mxu1 %vm675_vm1, %v2588_v57  ;;  %v2630_v22 = vsel %vm3075_vm2, %v592_v54, %v593_v60  ;;  %v2648_v27 = vsel %vm3075_vm2, %v591_v7, %v592_v54 }
 0x102   : > { %v434_v5 = vpop.f32.mrf.mxu0  ;;  %2148 = vmatpush3.bf16.msra.mxu1 %v770_v58  ;;  %v999_v32 = vsel %vm2560_vm3, %v2616_v8, 0.0  ;;  %v2668_v31 = vsel %vm3072_vm4, %v838_v2, %v839_v1  ;;  %v2674_v34 = vsel %vm3072_vm4, %v837_v18, %v838_v2  ;;  %v998_v41 = vsel %vm2570_vm6, %v2630_v22, 0.0 }
 0x103   : > { %v2618_v12 = vmax.f32 %v443_v62, 0.0  ;;  %v435_v13 = vadd.f32 %v1942_v21, %v434_v5  ;;  %v2634_v23 = vpack.c.bf16 %v2604_v3, %v2545_v35  ;;  %2241 = vmatprep.subr.msk.bf16.mxu1 %vm3076_vm0, %v1964_v63  ;;  %v841_v33 = vrot.slane %v2604_v3, 1  ;;  %v1974_v21 = vld [vmem:[%s3066_s3 + $0x10] sm:$0xf] }
 0x104   : > { %v595_v36 = vrot.slane %v2604_v3, 7  ;;  %v997_v54 = vsel %vm2566_vm5, %v2648_v27, 0.0  ;;  %v1208_v55 = vsel %vm2579_vm8, %v2674_v34, 0.0  ;;  %v1209_v61 = vsel %vm2591_vm9, %v2668_v31, 0.0 }
 0x105   : > { %v3071_v25 = vrot.slane %v2618_v12, 7  ;;  %v2644_v26 = vmax.f32 %v435_v13, 0.0  ;;  %2143 = vmatprep.mubr.msk.bf16.mxu1 %vm675_vm1, %v2634_v23  ;;  %v2705_v62 = vsel %vm3072_vm4, %v840_v20, %v841_v33  ;;  %v1005_v2 = vpack.c.bf16 %v999_v32, %v998_v41 }
 0x106   : > { %v1235_v5 = vsel %vm3076_vm0, %v2527_v17, 0  ;;  %v843_v13 = vrot.slane %v2641_v24, 1  ;;  %v509_v32 = vand.u32 7, %v2600_v0  ;;  %v1989_v17 = vld [vmem:[%s3066_s3 + $0x1c] sm:$0xf]  ;;  %v634_v52 = vsel %vm2570_vm6, %v2648_v27, 0.0 }
 0x107   : > { %v2679_v37 = vpack.c.bf16 %v2641_v24, %v2644_v26  ;;  %v607_v39 = vsel %vm3075_vm2, %v3071_v25, %v591_v7  ;;  %v842_v56 = vrot.slane %v2644_v26, 1  ;;  %v635_v41 = vsel %vm2560_vm3, %v2630_v22, 0.0 }
 0x108   : > { %v633_v42 = vsel %vm2566_vm5, %v607_v39, 0.0  ;;  %v996_v46 = vsel %vm2575_vm7, %v607_v39, 0.0  ;;  %v1216_v39 = vpack.c.bf16 %v1209_v61, %v1208_v55  ;;  %v596_v53 = vrot.slane %v2644_v26, 7 }
 0x109   : > { %v640_v58 = vpack.c.bf16 %v633_v42, %v2370_v40  ;;  %v1004_v60 = vpack.c.bf16 %v997_v54, %v996_v46  ;;  %2144 = vmatmul.mubr.msk.bf16.gmra.mxu1 %vm675_vm1, %v2679_v37  ;;  %v2722_v42 = vsel %vm3075_vm2, %v594_v49, %v595_v36  ;;  %v905_v46 = vsel %vm3076_vm0, %v1964_v63, 0 }
 0x10a   : > { %v516_v49 = vand.u32 7, %v2609_v6  ;;  %v2746_v54 = vsel %vm3072_vm4, %v842_v56, %v843_v13  ;;  %v848_v55 = vsel %vm3072_vm4, %v841_v33, %v842_v56  ;;  %v1580_v63 = vsel %vm2636_vm11, %v2705_v62, 0.0 }
 0x10b   : > { %2149 = vmatprep.mubr.msk.bf16.mxu1 %vm675_vm1, %v640_v58  ;;  %2169 = vmatprep.mubr.msk.bf16.mxu0 %vm675_vm1, %v1004_v60  ;;  %v637_v6 = vsel %vm2622_vm10, %v2722_v42, 0.0  ;;  %v1581_v58 = vsel %vm2650_vm12, %v848_v55, 0.0  ;;  %v597_v33 = vrot.slane %v2641_v24, 7  ;;  %v641_v56 = vpack.c.bf16 %v635_v41, %v634_v52 }
 0x10c   : > { %2170 = vmatmul.mubr.msk.bf16.vlgmr.msra.gmra.mxu0 %vm675_vm1, %v1005_v2  ;;  %v1211_v60 = vsel %vm2650_vm12, %v2705_v62, 0.0  ;;  %v2768_v61 = vpack.c.bf16 %v1581_v58, %v1580_v63  ;;  %v844_v1 = vrot.slane %v2618_v12, 1  ;;  %v636_v20 = vsel %vm2654_vm13, %v2616_v8, 0.0 }
 0x10d   : > { %2189 = vmatprep.mubr.msk.bf16.mxu0 %vm675_vm1, %v1216_v39  ;;  %2188 = vmatpush3.bf16.msra.mxu0 %v1235_v5  ;;  %v1212_v2 = vsel %vm2711_vm14, %v848_v55, 0.0  ;;  %v1213_v5 = vsel %vm2740_vm15, %v2746_v54, 0.0  ;;  %v642_v39 = vpack.c.bf16 %v637_v6, %v636_v20  ;;  %v1210_v52 = vsel %vm2636_vm11, %v850_v38, 0.0 }
 0x10e   : > { %2247 = vmatprep.subr.msk.bf16.mxu0 %vm3076_vm0, %v1989_v17  ;;  %v1217_v41 = vpack.c.bf16 %v1211_v60, %v1210_v52  ;;  %v2786_v63 = vsel %vm3075_vm2, %v596_v53, %v597_v33  ;;  %v2790_v58 = vsel %vm3075_vm2, %v595_v36, %v596_v53  ;;  %v1479_v25 = vsel %vm3076_vm0, %v1989_v17, 0 }
 0x10f   : > { %v1218_v6 = vpack.c.bf16 %v1213_v5, %v1212_v2  ;;  %vm2794_vm4 = vcmp.ge.s32.totalorder %v509_v32, 1  ;;  %vm2798_vm6 = vcmp.ge.s32.totalorder %v516_v49, 1  ;;  %vm2803_vm3 = vcmp.le.s32.totalorder %v509_v32, 6 }
 0x110   : > { %vm2807_vm2 = vcmp.le.s32.totalorder %v516_v49, 6  ;;  %vm3125_vm0 = vcmp.lt.s32.totalorder %v2531_v19, 7  ;;  %vm3127_vm7 = vcmask 1043456   ;;  %v638_v32 = vsel %vm2794_vm4, %v2790_v58, 0.0 }
 0x111   : > { %2150 = vmatmul.mubr.msk.bf16.vlgmr.msra.gmra.mxu1 %vm675_vm1, %v641_v56  ;;  %v846_v17 = vsel %vm3125_vm0, %v843_v13, %v844_v1  ;;  %vm3126_vm5 = vmmov %vm3125_vm0  ;;  %v639_v49 = vsel %vm2798_vm6, %v2786_v63, 0.0  ;;  %v879_v13 = vsel %vm2591_vm9, %v2674_v34, 0.0  ;;  %v1578_v53 = vsel %vm2579_vm8, %v2668_v31, 0.0 }
 0x112   : > { %2158 = vmatpush3.bf16.msra.mxu1 %v905_v46  ;;  %2153 = vmatprep.mubr.msk.bf16.mxu1 %vm675_vm1, %v642_v39  ;;  %v853_v46 = vsel %vm3126_vm5, %v844_v1, %v837_v18  ;;  %v1214_v18 = vsel %vm2803_vm3, %v846_v17, 0.0  ;;  %v643_v1 = vpack.c.bf16 %v639_v49, %v638_v32  ;;  %v1579_v2 = vsel %vm2591_vm9, %v850_v38, 0.0  ;;  %vm3128_vm0 = vmmov %vm3127_vm7 }
 0x113   : > { %2243 = vmatprep.subr.msk.bf16.mxu1 %vm3127_vm7, %v2515_v15  ;;  %v1215_v15 = vsel %vm2807_vm2, %v853_v46, 0.0  ;;  %v1583_v34 = vsel %vm2740_vm15, %v846_v17, 0.0  ;;  %v886_v5 = vpack.c.bf16 %v879_v13, %v2370_v40  ;;  %v2844_v39 = vpack.c.bf16 %v1579_v2, %v1578_v53  ;;  %vm3132_vm5 = vmmov %vm3128_vm0 }
 0x114   : > { %2190 = vmatmul.mubr.msk.bf16.vlgmr.msra.gmra.mxu0 %vm675_vm1, %v1217_v41  ;;  %v1584_v51 = vsel %vm2803_vm3, %v853_v46, 0.0  ;;  %v1219_v59 = vpack.c.bf16 %v1215_v15, %v1214_v18  ;;  %v883_v46 = vsel %vm2740_vm15, %v848_v55, 0.0  ;;  %v881_v32 = vsel %vm2650_vm12, %v850_v38, 0.0  ;;  %vm3134_vm7 = vmmov %vm3128_vm0 }
 0x115   : > { %2193 = vmatprep.mubr.msk.bf16.mxu0 %vm675_vm1, %v1218_v6  ;;  %2208 = vmatpush3.bf16.msra.mxu0 %v1479_v25  ;;  %v1582_v25 = vsel %vm2711_vm14, %v2746_v54, 0.0  ;;  %v2852_v41 = vpack.c.bf16 %v2370_v40, %v1584_v51  ;;  %v880_v6 = vsel %vm2636_vm11, %v2668_v31, 0.0  ;;  %v882_v13 = vsel %vm2711_vm14, %v2705_v62, 0.0  ;;  %vm3139_vm14 = vmmov %vm3128_vm0 }
 0x116   : > { %v2846_v52 = vpack.c.bf16 %v1583_v34, %v1582_v25  ;;  %v887_v49 = vpack.c.bf16 %v881_v32, %v880_v6  ;;  %v888_v18 = vpack.c.bf16 %v883_v46, %v882_v13  ;;  %v1001_v28 = vsel %vm2622_vm10, %v2790_v58, 0.0 }
 0x117   : > { %v3129_v7 = vrot.slane %v2618_v12, 7  ;;  %v1098_v36 = vpack.c.bf16 %v2558_v44, %v2541_v29  ;;  %v1994_v29 = vld [vmem:[%s3066_s3 + $0x20] sm:$0xf]  ;;  %vm3135_vm8 = vnez %v3100_v50  ;;  %vm3136_vm9 = vnez %v3096_v47 }
 0x118   : > { %v1101_v44 = vpack.c.bf16 %v2618_v12, %v2641_v24  ;;  %vm3137_vm11 = vnez %v3094_v45  ;;  %v1338_v50 = vsel %vm2654_vm13, %v2790_v58, 0.0  ;;  %v1339_v47 = vsel %vm2622_vm10, %v2786_v63, 0.0  ;;  %vm3141_vm10 = vmmov %vm3128_vm0 }
 0x119   : > { %2154 = vmatmul.mubr.msk.bf16.gmra.mxu1 %vm675_vm1, %v643_v1  ;;  %vm3138_vm12 = vnez %v3098_v48  ;;  %v1605_v24 = vsel %vm3139_vm14, %v1994_v29, 0  ;;  %v1707_v48 = vld [vmem:[%s3068_s5] sm:$0xf] }
 0x11a   : > { %2159 = vmatprep.mubr.msk.bf16.mxu1 %vm675_vm1, %v886_v5 }
 0x11c   : > { %2194 = vmatmul.mubr.msk.bf16.gmra.mxu0 %vm675_vm1, %v1219_v59 }
 0x11d   : > { %2209 = vmatprep.mubr.msk.bf16.mxu0 %vm675_vm1, %v2588_v57  ;;  %v884_v57 = vsel %vm2803_vm3, %v2746_v54, 0.0  ;;  %vm3130_vm3 = vcmp.lt.s32.totalorder %v2531_v19, 1  ;;  %v1002_v54 = vsel %vm2794_vm4, %v2786_v63, 0.0  ;;  %v1984_v19 = vld [vmem:[%s3066_s3 + $0x18] sm:$0xf] }
 0x11e   : > { %v600_v0 = vsel %vm3130_vm3, %v597_v33, %v3129_v7  ;;  %v1099_v33 = vpack.c.bf16 %v2545_v35, %v2555_v43  ;;  %v1334_v35 = vsel %vm3135_vm8, %v2648_v27, 0.0  ;;  %v1335_v43 = vsel %vm3136_vm9, %v2630_v22, 0.0 }
 0x11f   : > { %v1003_v55 = vsel %vm2798_vm6, %v600_v0, 0.0  ;;  %vm3133_vm6 = vmmov %vm3128_vm0  ;;  %v1344_v27 = vpack.c.bf16 %v1339_v47, %v1338_v50  ;;  %v1340_v45 = vsel %vm2794_vm4, %v600_v0, 0.0 }
 0x120   : > { %v1007_v38 = vpack.c.bf16 %v1003_v55, %v1002_v54  ;;  %v1361_v56 = vsel %vm3133_vm6, %v1984_v19, 0  ;;  %v1345_v30 = vpack.c.bf16 %v2370_v40, %v1340_v45  ;;  %vm3140_vm4 = vmmov %vm3128_vm0 }
 0x121   : > { %2160 = vmatmul.mubr.msk.bf16.vlgmr.msra.gmra.mxu1 %vm675_vm1, %v887_v49  ;;  %2249 = vmatprep.subr.msk.bf16.mxu0 %vm3140_vm4, %v1707_v48 }
 0x122   : > { %2238 = vmatpush3.bf16.msra.mxu1 %v2521_v16  ;;  %2163 = vmatprep.mubr.msk.bf16.mxu1 %vm675_vm1, %v888_v18  ;;  %v885_v16 = vsel %vm2807_vm2, %v846_v17, 0.0  ;;  %vm3131_vm2 = vmmov %vm3128_vm0  ;;  %v1100_v17 = vpack.c.bf16 %v2644_v26, %v2604_v3  ;;  %v1342_v3 = vpack.c.bf16 %v1335_v43, %v1334_v35  ;;  %v1337_v26 = vsel %vm3137_vm11, %v2722_v42, 0.0 }
 0x123   : > { %2244 = vmatprep.subr.msk.bf16.mxu1 %vm3128_vm0, %v1974_v21  ;;  %v889_v31 = vpack.c.bf16 %v885_v16, %v884_v57  ;;  %v1117_v60 = vsel %vm3131_vm2, %v1974_v21, 0 }
 0x124   : > { %2210 = vmatmul.mubr.msk.bf16.vlgmr.msra.gmra.mxu0 %vm675_vm1, %v2634_v23  ;;  %v1000_v23 = vsel %vm2654_vm13, %v2722_v42, 0.0 }
 0x125   : > { %2213 = vmatprep.mubr.msk.bf16.mxu0 %vm675_vm1, %v2679_v37  ;;  %v1006_v62 = vpack.c.bf16 %v1001_v28, %v1000_v23  ;;  %v1463_v37 = vpack.c.bf16 %v2370_v40, %v2618_v12  ;;  %v1336_v12 = vsel %vm3138_vm12, %v2616_v8, 0.0  ;;  %v1728_v40 = vsel %vm3141_vm10, %v1707_v48, 0 }
 0x126   : > { %v1343_v22 = vpack.c.bf16 %v1337_v26, %v1336_v12  ;;  %2228 = vmatpush3.bf16.msra.mxu0 %v1728_v40 }
 0x129   : > { %2164 = vmatmul.mubr.msk.bf16.gmra.mxu1 %vm675_vm1, %v889_v31 }
 0x12a   : > { %2173 = vmatprep.mubr.msk.bf16.mxu1 %vm675_vm1, %v1006_v62 }
 0x12c   : > { %2214 = vmatmul.mubr.msk.bf16.gmra.mxu0 %vm675_vm1, %v1463_v37 }
 0x131   : > { %2174 = vmatmul.mubr.msk.bf16.vlgmr.msra.gmra.mxu1 %vm675_vm1, %v1007_v38 }
 0x132   : > { %2178 = vmatpush3.bf16.msra.mxu1 %v1117_v60  ;;  %2179 = vmatprep.mubr.msk.bf16.mxu1 %vm675_vm1, %v1098_v36 }
 0x133   : > { %2246 = vmatprep.subr.msk.bf16.mxu1 %vm3132_vm5, %v1984_v19 }
 0x139   : > { %2180 = vmatmul.mubr.msk.bf16.vlgmr.msra.gmra.mxu1 %vm675_vm1, %v1099_v33 }
 0x13a   : > { %2198 = vmatpush3.bf16.msra.mxu1 %v1361_v56  ;;  %2183 = vmatprep.mubr.msk.bf16.mxu1 %vm675_vm1, %v1100_v17 }
 0x13b   : > { %2248 = vmatprep.subr.msk.bf16.mxu1 %vm3134_vm7, %v1994_v29 }
 0x141   : > { %2184 = vmatmul.mubr.msk.bf16.gmra.mxu1 %vm675_vm1, %v1101_v44 }
 0x142   : > { %2199 = vmatprep.mubr.msk.bf16.mxu1 %vm675_vm1, %v1342_v3 }
 0x149   : > { %2200 = vmatmul.mubr.msk.bf16.vlgmr.msra.gmra.mxu1 %vm675_vm1, %v1343_v22 }
 0x14a   : > { %2218 = vmatpush3.bf16.msra.mxu1 %v1605_v24  ;;  %2203 = vmatprep.mubr.msk.bf16.mxu1 %vm675_vm1, %v1344_v27 }
 0x151   : > { %2204 = vmatmul.mubr.msk.bf16.gmra.mxu1 %vm675_vm1, %v1345_v30 }
 0x152   : > { %2219 = vmatprep.mubr.msk.bf16.mxu1 %vm675_vm1, %v2844_v39 }
 0x159   : > { %2220 = vmatmul.mubr.msk.bf16.vlgmr.msra.gmra.mxu1 %vm675_vm1, %v2768_v61 }
 0x15a   : > { %2223 = vmatprep.mubr.msk.bf16.mxu1 %vm675_vm1, %v2846_v52 }
 0x161   : > { %2224 = vmatmul.mubr.msk.bf16.gmra.mxu1 %vm675_vm1, %v2852_v41 }
 0x1c1   : > { %v2141_v8 = vpop.f32.mrf.mxu1 }
 0x1c3   : > { %v726_v14 = vpop.f32.mrf.mxu1 }
 0x1c5   : > { %v2142_v42 = vpop.f32.mrf.mxu1 }
 0x1c7   : > { %v729_v63 = vpop.f32.mrf.mxu1 }
 0x1c9   : > { %v2145_v61 = vpop.f32.mrf.mxu1 }
 0x1cb   : > { %v2968_v58 = vpop.f32.mrf.mxu1 }
 0x1cc   : > { %v2171_v5 = vpop.f32.mrf.mxu0 }
 0x1cd   : > { %v2970_v20 = vpop.f32.mrf.mxu1 }
 0x1ce   : > { %v1059_v59 = vpop.f32.mrf.mxu0 }
 0x1cf   : > { %v2972_v15 = vpop.f32.mrf.mxu1 }
 0x1d0   : > { %v2172_v46 = vpop.f32.mrf.mxu0 }
 0x1d1   : > { %v2151_v53 = vpop.f32.mrf.mxu1 }
 0x1d2   : > { %v815_v1 = vadd.f32 %v2151_v53, %v2141_v8  ;;  %v1062_v13 = vpop.f32.mrf.mxu0 }
 0x1d3   : > { %v806_v2 = vpop.f32.mrf.mxu1 }
 0x1d4   : > { %v2191_v57 = vpop.f32.mrf.mxu0  ;;  %v807_v50 = vadd.f32 %v806_v2, %v726_v14 }
 0x1d5   : > { %v2152_v25 = vpop.f32.mrf.mxu1 }
 0x1d6   : > { %v1271_v31 = vpop.f32.mrf.mxu0  ;;  %v818_v24 = vadd.f32 %v2152_v25, %v2142_v42 }
 0x1d7   : > { %v809_v34 = vpop.f32.mrf.mxu1 }
 0x1d8   : > { %v2192_v37 = vpop.f32.mrf.mxu0  ;;  %v810_v30 = vadd.f32 %v809_v34, %v729_v63 }
 0x1d9   : > { %v2155_v39 = vpop.f32.mrf.mxu1 }
 0x1da   : > { %v831_v52 = vadd.f32 %v2155_v39, %v2145_v61  ;;  %v1274_v54 = vpop.f32.mrf.mxu0 }
 0x1db   : > { %v822_v51 = vpop.f32.mrf.mxu1 }
 0x1dc   : > { %v2976_v60 = vpop.f32.mrf.mxu0 }
 0x1dd   : > { %v2156_v41 = vpop.f32.mrf.mxu1 }
 0x1de   : > { %v2978_v33 = vpop.f32.mrf.mxu0  ;;  %v834_v63 = vadd.f32 %v2156_v41, %v2970_v20 }
 0x1df   : > { %v2974_v6 = vpop.f32.mrf.mxu1 }
 0x1e0   : > { %v2980_v29 = vpop.f32.mrf.mxu0 }
 0x1e1   : > { %v2161_v32 = vpop.f32.mrf.mxu1 }
 0x1e2   : > { %v2982_v44 = vpop.f32.mrf.mxu0  ;;  %v974_v47 = vadd.f32 %v2161_v32, %v815_v1 }
 0x1e3   : > { %v941_v49 = vpop.f32.mrf.mxu1  ;;  %3142 = vst [vmem:[#allocation9_spill] sm:$0xff] %v2982_v44  ;;  %v823_v44 = vadd.f32 %v822_v51, %v2968_v58 }
 0x1e4   : > { %v2211_v12 = vpop.f32.mrf.mxu0  ;;  %v972_v27 = vadd.f32 %v941_v49, %v807_v50  ;;  %v1092_v40 = vadd.f32 %v2171_v5, %v974_v47 }
 0x1e5   : > { %v2162_v18 = vpop.f32.mrf.mxu1 }
 0x1e6   : > { %v975_v48 = vadd.f32 %v2162_v18, %v818_v24  ;;  %v1515_v8 = vpop.f32.mrf.mxu0  ;;  %v1090_v10 = vadd.f32 %v1059_v59, %v972_v27 }
 0x1e7   : > { %v944_v21 = vpop.f32.mrf.mxu1 }
 0x1e8   : > { %v973_v53 = vadd.f32 %v944_v21, %v810_v30  ;;  %v1093_v9 = vadd.f32 %v2172_v46, %v975_v48  ;;  %v2212_v14 = vpop.f32.mrf.mxu0 }
 0x1e9   : > { %v2165_v28 = vpop.f32.mrf.mxu1 }
 0x1ea   : > { %v978_v2 = vadd.f32 %v2165_v28, %v831_v52  ;;  %v1091_v42 = vadd.f32 %v1062_v13, %v973_v53  ;;  %v1518_v59 = vpop.f32.mrf.mxu0 }
 0x1eb   : > { %v957_v16 = vpop.f32.mrf.mxu1 }
 0x1ec   : > { %v976_v34 = vadd.f32 %v957_v16, %v823_v44 }
 0x1ed   : > { %v2166_v23 = vpop.f32.mrf.mxu1 }
 0x1ee   : > { %v979_v46 = vadd.f32 %v2166_v23, %v834_v63 }
 0x1ef   : > { %v960_v62 = vpop.f32.mrf.mxu1 }
 0x1f1   : > { %v2175_v7 = vpop.f32.mrf.mxu1 }
 0x1f2   : > { %v1096_v49 = vadd.f32 %v2175_v7, %v978_v2 }
 0x1f3   : > { %v1075_v0 = vpop.f32.mrf.mxu1 }
 0x1f4   : > { %v1094_v58 = vadd.f32 %v1075_v0, %v976_v34 }
 0x1f5   : > { %v2176_v55 = vpop.f32.mrf.mxu1 }
 0x1f7   : > { %v1078_v38 = vpop.f32.mrf.mxu1 }
 0x1f9   : > { %v2181_v36 = vpop.f32.mrf.mxu1 }
 0x1fa   : > { %v1186_v39 = vadd.f32 %v2181_v36, %v1092_v40 }
 0x1fb   : > { %v1153_v19 = vpop.f32.mrf.mxu1 }
 0x1fc   : > { %v1184_v4 = vadd.f32 %v1153_v19, %v1090_v10  ;;  %v1304_v25 = vadd.f32 %v2191_v57, %v1186_v39  ;;  %v826_v10 = vadd.f32 %v2974_v6, %v2972_v15  ;;  %v1097_v57 = vadd.f32 %v2176_v55, %v979_v46 }
 0x1fd   : > { %v2182_v56 = vpop.f32.mrf.mxu1 }
 0x1fe   : > { %v1187_v32 = vadd.f32 %v2182_v56, %v1093_v9  ;;  %v1302_v36 = vadd.f32 %v1271_v31, %v1184_v4  ;;  %v977_v13 = vadd.f32 %v960_v62, %v826_v10  ;;  %v2215_v56 = vpop.f32.mrf.mxu0  ;;  %v1999_v62 = vld [vmem:[%s3067_s4] ss:$0 sm:$0xff] }
 0x1ff   : > { %v1156_v17 = vpop.f32.mrf.mxu1 }
 0x200   : > { %v1185_v18 = vadd.f32 %v1156_v17, %v1091_v42  ;;  %v1305_v9 = vadd.f32 %v2192_v37, %v1187_v32  ;;  %v1095_v17 = vadd.f32 %v1078_v38, %v977_v13  ;;  %v1531_v50 = vpop.f32.mrf.mxu0 }
 0x201   : > { %v2185_v35 = vpop.f32.mrf.mxu1 }
 0x202   : > { %v1190_v19 = vadd.f32 %v2185_v35, %v1096_v49  ;;  %v1303_v16 = vadd.f32 %v1274_v54, %v1185_v18  ;;  %v2216_v40 = vpop.f32.mrf.mxu0 }
 0x203   : > { %v1169_v43 = vpop.f32.mrf.mxu1 }
 0x204   : > { %v1188_v28 = vadd.f32 %v1169_v43, %v1094_v58  ;;  %v1308_v15 = vadd.f32 %v2976_v60, %v1190_v19 }
 0x205   : > { %v2186_v3 = vpop.f32.mrf.mxu1 }
 0x206   : > { %v1191_v4 = vadd.f32 %v2186_v3, %v1097_v57  ;;  %v1306_v35 = vadd.f32 %v2978_v33, %v1188_v28 }
 0x207   : > { %v1172_v26 = vpop.f32.mrf.mxu1 }
 0x208   : > { %v1189_v0 = vadd.f32 %v1172_v26, %v1095_v17  ;;  %v1309_v3 = vadd.f32 %v2980_v29, %v1191_v4  ;;  %v3143_v26 = vld [vmem:[#allocation9_spill] sm:$0xff] }
 0x209   : > { %v2201_v22 = vpop.f32.mrf.mxu1 }
 0x20a   : > { %v1430_v21 = vadd.f32 %v2201_v22, %v1304_v25  ;;  %v1307_v24 = vadd.f32 %v3143_v26, %v1189_v0  ;;  %v3147_v26 = vld [vmem:[#allocation7_spill] sm:$0xff] }
 0x20b   : > { %v1397_v45 = vpop.f32.mrf.mxu1 }
 0x20c   : > { %v1428_v52 = vadd.f32 %v1397_v45, %v1302_v36  ;;  %v1548_v7 = vadd.f32 %v2211_v12, %v1430_v21 }
 0x20d   : > { %v2202_v61 = vpop.f32.mrf.mxu1 }
 0x20e   : > { %v1431_v41 = vadd.f32 %v2202_v61, %v1305_v9  ;;  %v1546_v23 = vadd.f32 %v1515_v8, %v1428_v52 }
 0x20f   : > { %v1400_v11 = vpop.f32.mrf.mxu1 }
 0x210   : > { %v1429_v44 = vadd.f32 %v1400_v11, %v1303_v16  ;;  %v1549_v43 = vadd.f32 %v2212_v14, %v1431_v41  ;;  %v2000_v41 = vld [vmem:[%s3069_s6] ss:$0 sm:$0xff] }
 0x211   : > { %v2205_v1 = vpop.f32.mrf.mxu1 }
 0x212   : > { %v1434_v55 = vadd.f32 %v2205_v1, %v1308_v15  ;;  %v1547_v12 = vadd.f32 %v1518_v59, %v1429_v44 }
 0x213   : > { %v1413_v5 = vpop.f32.mrf.mxu1 }
 0x214   : > { %v1432_v38 = vadd.f32 %v1413_v5, %v1306_v35  ;;  %v1552_v48 = vadd.f32 %v2215_v56, %v1434_v55  ;;  %v1534_v5 = vpop.f32.mrf.mxu0  ;;  %v3144_v56 = vld [vmem:[#allocation6_spill] sm:$0xff] }
 0x215   : > { %v2206_v51 = vpop.f32.mrf.mxu1  ;;  %v1797_v17 = vunpack.c.l.bf16 %v3144_v56 }
 0x216   : > { %v1435_v22 = vadd.f32 %v2206_v51, %v1309_v3  ;;  %v1550_v53 = vadd.f32 %v1531_v50, %v1432_v38  ;;  %v3146_v38 = vld [vmem:[#allocation8_spill] sm:$0xff] }
 0x217   : > { %v1416_v20 = vpop.f32.mrf.mxu1  ;;  %v1801_v3 = vunpack.c.l.bf16 %v3146_v38 }
 0x218   : > { %v1433_v8 = vadd.f32 %v1416_v20, %v1307_v24  ;;  %v1553_v32 = vadd.f32 %v2216_v40, %v1435_v22  ;;  %v1799_v24 = vunpack.c.l.bf16 %v3147_v26 }
 0x219   : > { %v2221_v31 = vpop.f32.mrf.mxu1 }
 0x21a   : > { %v1674_v6 = vadd.f32 %v2221_v31, %v1548_v7  ;;  %v1551_v10 = vadd.f32 %v1534_v5, %v1433_v8  ;;  %v3145_v31 = vld [vmem:[#allocation5_spill] sm:$0xff] }
 0x21b   : > { %v1641_v37 = vpop.f32.mrf.mxu1  ;;  %v1795_v44 = vunpack.c.l.bf16 %v3145_v31  ;;  %v1796_v0 = vunpack.c.h.bf16 %v3145_v31 }
 0x21c   : > { %v1672_v54 = vadd.f32 %v1641_v37, %v1546_v23  ;;  %v1689_v47 = vadd.f32 %v1999_v62, %v1674_v6  ;;  %v1798_v6 = vunpack.c.h.bf16 %v3144_v56 }
 0x21d   : > { %v2222_v11 = vpop.f32.mrf.mxu1 }
 0x21e   : > { %v1675_v60 = vadd.f32 %v2222_v11, %v1549_v43  ;;  %v1687_v27 = vadd.f32 %v1999_v62, %v1672_v54  ;;  %v1697_v39 = vmax.f32 %v1689_v47, 0.0 }
 0x21f   : > { %v1644_v33 = vpop.f32.mrf.mxu1 }
 0x220   : > { %v1690_v45 = vadd.f32 %v1999_v62, %v1675_v60  ;;  %v1673_v30 = vadd.f32 %v1644_v33, %v1547_v12  ;;  %v1695_v42 = vmax.f32 %v1687_v27, 0.0  ;;  %v1802_v33 = vunpack.c.h.bf16 %v3146_v38 }
 0x221   : > { %v2225_v61 = vpop.f32.mrf.mxu1 }
 0x222   : > { %v1698_v14 = vmax.f32 %v1690_v45, 0.0  ;;  %v1688_v1 = vadd.f32 %v1999_v62, %v1673_v30  ;;  %v1678_v29 = vadd.f32 %v2225_v61, %v1552_v48 }
 0x223   : > { %v1657_v2 = vpop.f32.mrf.mxu1 }
 0x224   : > { %v1704_v25 = vpack.c.bf16 %v1698_v14, %v1697_v39  ;;  %v1696_v63 = vmax.f32 %v1688_v1, 0.0  ;;  %v1676_v34 = vadd.f32 %v1657_v2, %v1550_v53  ;;  %v1693_v21 = vadd.f32 %v1999_v62, %v1678_v29 }
 0x225   : > { %v2226_v49 = vpop.f32.mrf.mxu1  ;;  %v1800_v39 = vunpack.c.h.bf16 %v3147_v26 }
 0x226   : > { %v1703_v18 = vpack.c.bf16 %v1696_v63, %v1695_v42  ;;  %v1679_v36 = vadd.f32 %v2226_v49, %v1553_v32  ;;  %v1691_v46 = vadd.f32 %v1999_v62, %v1676_v34  ;;  %v1701_v19 = vmax.f32 %v1693_v21, 0.0 }
 0x227   : > { %v1660_v59 = vpop.f32.mrf.mxu1 }
 0x228   : > { %v1694_v58 = vadd.f32 %v1999_v62, %v1679_v36  ;;  %v1677_v51 = vadd.f32 %v1660_v59, %v1551_v10  ;;  %2229 = vmatprep.mubr.msk.bf16.mxu0 %vm675_vm1, %v1703_v18  ;;  %v1699_v13 = vmax.f32 %v1691_v46, 0.0 }
 0x229   : > { %2230 = vmatmul.mubr.msk.bf16.vlgmr.msra.gmra.mxu0 %vm675_vm1, %v1704_v25 }
 0x22a   : > { %v1702_v52 = vmax.f32 %v1694_v58, 0.0  ;;  %v1692_v9 = vadd.f32 %v1999_v62, %v1677_v51 }
 0x22c   : > { %v1706_v57 = vpack.c.bf16 %v1702_v52, %v1701_v19  ;;  %v1700_v28 = vmax.f32 %v1692_v9, 0.0 }
 0x22e   : > { %v1705_v20 = vpack.c.bf16 %v1700_v28, %v1699_v13 }
 0x230   : > { %2233 = vmatprep.mubr.msk.bf16.mxu0 %vm675_vm1, %v1705_v20 }
 0x231   : > { %2234 = vmatmul.mubr.msk.bf16.gmra.mxu0 %vm675_vm1, %v1706_v57 }
 0x2e9   : > { %v2231_v16 = vpop.f32.mrf.mxu0 }
 0x2ea   : > { %v1773_v7 = vadd.f32 %v2231_v16, %v2000_v41 }
 0x2eb   : > { %v1764_v4 = vpop.f32.mrf.mxu0 }
 0x2ec   : > { %v1765_v15 = vadd.f32 %v2000_v41, %v1764_v4  ;;  %v1805_v35 = vadd.f32 %v1797_v17, %v1773_v7 }
 0x2ed   : > { %v2232_v23 = vpop.f32.mrf.mxu0 }
 0x2ee   : > { %v1776_v62 = vadd.f32 %v2232_v23, %v2000_v41  ;;  %v1803_v55 = vadd.f32 %v1795_v44, %v1765_v15  ;;  %v1813_v11 = vmax.f32 %v1805_v35, 0.0 }
 0x2ef   : > { %v1767_v37 = vpop.f32.mrf.mxu0 }
 0x2f0   : > { %v1806_v54 = vadd.f32 %v1798_v6, %v1776_v62  ;;  %v1768_v43 = vadd.f32 %v2000_v41, %v1767_v37  ;;  %v1811_v27 = vmax.f32 %v1803_v55, 0.0 }
 0x2f1   : > { %v2235_v50 = vpop.f32.mrf.mxu0 }
 0x2f2   : > { %v1814_v47 = vmax.f32 %v1806_v54, 0.0  ;;  %v1804_v60 = vadd.f32 %v1796_v0, %v1768_v43  ;;  %v1789_v12 = vadd.f32 %v2235_v50, %v2000_v41 }
 0x2f3   : > { %v1780_v22 = vpop.f32.mrf.mxu0 }
 0x2f4   : > { %v2036_v45 = vpack.c.bf16 %v1814_v47, %v1813_v11  ;;  %v1812_v30 = vmax.f32 %v1804_v60, 0.0  ;;  %v1781_v48 = vadd.f32 %v2000_v41, %v1780_v22  ;;  %v1809_v61 = vadd.f32 %v1801_v3, %v1789_v12 }
 0x2f5   : > { %v2236_v40 = vpop.f32.mrf.mxu0 }
 0x2f6   : > { %2048 = vst [vmem:[%s271_s20 + $0x8] sm:$0xff] %v2036_v45   ;;  %v2031_v8 = vpack.c.bf16 %v1812_v30, %v1811_v27  ;;  %v1792_v53 = vadd.f32 %v2236_v40, %v2000_v41  ;;  %v1807_v1 = vadd.f32 %v1799_v24, %v1781_v48  ;;  %v1817_v32 = vmax.f32 %v1809_v61, 0.0 }
 0x2f7   : > { %v1783_v14 = vpop.f32.mrf.mxu0 }
 0x2f8   : > { %2032 = vst [vmem:[%s271_s20] sm:$0xff] %v2031_v8   ;;  %v1810_v29 = vadd.f32 %v1802_v33, %v1792_v53  ;;  %v1784_v2 = vadd.f32 %v2000_v41, %v1783_v14  ;;  %v1815_v63 = vmax.f32 %v1807_v1, 0.0 }
 0x2fa   : > { %v1818_v42 = vmax.f32 %v1810_v29, 0.0  ;;  %v1808_v25 = vadd.f32 %v1800_v39, %v1784_v2 }
 0x2fc   : > { %v2046_v34 = vpack.c.bf16 %v1818_v42, %v1817_v32  ;;  %v1816_v5 = vmax.f32 %v1808_v25, 0.0 }
 0x2fe   : > { %2050 = vst [vmem:[%s271_s20 + $0x18] sm:$0xff] %v2046_v34   ;;  %v2041_v49 = vpack.c.bf16 %v1816_v5, %v1815_v63 }
 0x300   : > { %2049 = vst [vmem:[%s271_s20 + $0x10] sm:$0xff] %v2041_v49  }
 0x301   : > { %2321 = shalt.err (!%p2318_p3)
}
 0x302   : > { %s2322_s16 = scalar_lea.hbm %s3017_s8, 512  ;;  %s2326_s19 = scalar_lea.hbm %s3070_s7, 1024 }
 0x303   : > { %p2323_p4 = scmp.ne.s32.totalorder %s3017_s8, %s2322_s16  ;;  %p2327_p9 = scmp.lt.s32.totalorder %s3017_s8, %s3070_s7 }
 0x304   : > { %p2328_p10 = scmp.lt.s32.totalorder %s2326_s19, %s2322_s16 }
 0x305   : > { %p2324_p7 = pnand %p2323_p4, %p2452_p5 }
 0x306   : > { %p2329_p11 = por %p2328_p10, %p2327_p9 }
 0x307   : > { %p2325_p8 = pneg %p2324_p7 }
 0x309   : > { %p2330_p12 = pnand %p2329_p11, %p2325_p8 }
 0x30b   : > { %2333 = shalt.err (!%p2330_p12)
}
 0x30c   : > { %s2372_s29 = smov 64   ;;  %s2373_s23 = smov 4  }
 0x30d   : > { %2250 = dma.vmem_to_hbm [thread:$0]  (%p2452_p5), %s3019_s21, 512, %s3017_s8, %s3023_s9, %s2372_s29, %s2372_s29, %s2373_s23  }
 0x30e PF: > { %p2256_p13 = scmp.ge.s32.totalorder %s2368_s27, 2  ;;  %s1888_s28 = sand.u32 1, %s2356_s24  }
 0x30f   : > { %s1889_s13 = scalar_lea.sflag [#allocation3], %s1888_s28 }
 0x310   : > { %p2253_p0 = pnand %p2256_p13, %p2456_p6 }
 0x312   : > { %p2254_p1 = pneg %p2253_p0 }
 0x314   : > { %2351 = dma.done.wait (%p2254_p1), %s1889_s13, 512  }
 0x315   : > { %2353 = vsyncadd (%p2254_p1), %s1889_s13, 4294966784  ;;  %p17_p2 = scmp.ge.s32.totalorder %s2439_s30, 4   ;;  %s3148_s24 = smov %s2360_s25 }
 0x316   : > { %s3149_s25 = smov %s2364_s26  ;;  %s3150_s26 = smov %s2450_s10 }
 0x317   : > { %s3151_s27 = smov %s2439_s30  ;;  %19 = sbr.rel (!%p17_p2) target bundleno = 3 (0x3), region = 91 }
 0x31c   :  { %1894 = vsyncpa [#allocation3], 1 }
 0x31d   :  { %1896 = vsyncpa [#allocation3 + $0x1], 1 }

</bundles_post_ra>
